<compile_context>
chip_gen: v5e
topology: v5e:2x2
jax: 0.10.0
libtpu: 0.0.40
codegen_flags: <defaults>
</compile_context>

<pallas_src>
import numpy as np
import jax
import jax.numpy as jnp
from jax.experimental import pallas as pl
from jax.experimental.pallas import tpu as pltpu


def double_conv_kernel(x_ref, w1_ref, s1_ref, t1_ref, w2_ref, s2_ref, t2_ref,
                       o_ref, xpad2_ref):
    # x_ref: (Bt, H+2, W*Cin) bf16, height-padded on the host, (W*Cin) on lanes.
    Bt, Hp2, _ = x_ref.shape
    H = Hp2 - 2
    WCm = w1_ref.shape[2]
    WCout = w2_ref.shape[2]

    def banded_conv(pad_ref, w_ref, s_ref, t_ref):
        # pad_ref: (Bt, H+2, W*C) height-padded activation (lane-dense)
        # w_ref:   (3, W*C, W*Co) banded weights; one matmul per ky tap.
        K = w_ref.shape[1]
        N = w_ref.shape[2]
        acc = jnp.zeros((Bt * H, N), jnp.float32)
        for ky in range(3):
            a = pad_ref[:, ky:ky + H, :].reshape(Bt * H, K)
            acc = acc + jnp.dot(a, w_ref[ky], preferred_element_type=jnp.float32)
        # Folded BatchNorm (conv bias pre-folded into the shift), then ReLU.
        # Dropout(0.1) is identity at inference.
        return jnp.maximum(acc * s_ref[...] + t_ref[...], 0.0)

    # ---- conv block 1: reads the host-padded input directly ----
    h1 = banded_conv(x_ref, w1_ref, s1_ref, t1_ref)            # (Bt*H, W*Cm) f32

    # ---- conv block 2: height-padded intermediate lives in VMEM scratch ----
    # Zero only the two border rows; the interior rows are fully overwritten.
    zrow = jnp.zeros((Bt, 1, WCm), xpad2_ref.dtype)
    xpad2_ref[:, 0:1, :] = zrow
    xpad2_ref[:, H + 1:H + 2, :] = zrow
    xpad2_ref[:, 1:H + 1, :] = h1.reshape(Bt, H, WCm).astype(xpad2_ref.dtype)
    h2 = banded_conv(xpad2_ref, w2_ref, s2_ref, t2_ref)        # (Bt*H, W*Cout) f32

    # Lane-dense store: minor dim W*Cout = 128 -> unmasked vst.
    o_ref[...] = h2.reshape(Bt, H, WCout).astype(o_ref.dtype)


def _banded_conv_weights(w_oihw, W):
    """OIHW (Co, Ci, 3, 3) -> (3, W*Ci, W*Co) block-Toeplitz-over-width weights.

    band[ky, wi*Ci + ci, wo*Co + co] = w[co, ci, ky, wi - wo + 1] for |wi-wo| <= 1
    (zero elsewhere): the conv's width zero-padding is absorbed into the band.
    """
    w = np.asarray(w_oihw, np.float32)
    Co, Ci, KH, KW = w.shape
    band = np.zeros((KH, W * Ci, W * Co), np.float32)
    for ky in range(KH):
        for kx in range(KW):
            blk = w[:, :, ky, kx].T                      # (Ci, Co)
            for wo in range(W):
                wi = wo + kx - 1
                if 0 <= wi < W:
                    band[ky, wi * Ci:(wi + 1) * Ci, wo * Co:(wo + 1) * Co] = blk
    return jnp.asarray(band, jnp.bfloat16)


def _pick_batch_tile(B, max_bt=8):
    # Largest divisor of B that is <= max_bt while keeping >= 2 grid steps
    # (so v7x's two TensorCores both get work under "parallel" semantics).
    best = 1
    for bt in range(1, min(B, max_bt) + 1):
        if B % bt == 0 and (B == 1 or B // bt >= 2):
            best = bt
    return best


def double_conv_forward(x_nchw, w1, b1, s1, t1, w2, b2, s2, t2):
    """x_nchw: (B, Cin, H, W); w1: (Cm, Cin, 3, 3); w2: (Cout, Cm, 3, 3);
    s*/t*: folded BatchNorm scale/shift per channel. Returns NCHW f32 output."""
    B, Cin, H, W = x_nchw.shape
    Cm = w1.shape[0]
    Cout = w2.shape[0]
    bt = _pick_batch_tile(B)

    # NHWC, flatten (W, C) onto the lane axis, height-pad by 1 row, bf16.
    x_lane = jnp.transpose(x_nchw, (0, 2, 3, 1)).reshape(B, H, W * Cin)
    x_lane = jnp.pad(x_lane, ((0, 0), (1, 1), (0, 0))).astype(jnp.bfloat16)

    w1b = _banded_conv_weights(w1, W)                    # (3, W*Cin, W*Cm)
    w2b = _banded_conv_weights(w2, W)                    # (3, W*Cm, W*Cout)

    # Fold conv bias into the BN shift and pre-tile to the (W*C) lane layout:
    # (conv + b)*s + t == conv*s + (b*s + t);   lane index = w*C + c.
    s1f = jnp.tile(s1.astype(jnp.float32), W).reshape(1, W * Cm)
    t1f = jnp.tile((b1 * s1 + t1).astype(jnp.float32), W).reshape(1, W * Cm)
    s2f = jnp.tile(s2.astype(jnp.float32), W).reshape(1, W * Cout)
    t2f = jnp.tile((b2 * s2 + t2).astype(jnp.float32), W).reshape(1, W * Cout)

    out_flat = pl.pallas_call(
        double_conv_kernel,
        out_shape=jax.ShapeDtypeStruct((B, H, W * Cout), jnp.bfloat16),
        grid_spec=pltpu.PrefetchScalarGridSpec(
            num_scalar_prefetch=0,
            grid=(B // bt,),
            in_specs=[
                # Bt height-padded images per grid step.
                pl.BlockSpec((bt, H + 2, W * Cin), lambda b: (b, 0, 0)),
                # Weights / BN params: constant index_map -> VMEM-resident.
                pl.BlockSpec((3, W * Cin, W * Cm), lambda b: (0, 0, 0)),
                pl.BlockSpec((1, W * Cm), lambda b: (0, 0)),
                pl.BlockSpec((1, W * Cm), lambda b: (0, 0)),
                pl.BlockSpec((3, W * Cm, W * Cout), lambda b: (0, 0, 0)),
                pl.BlockSpec((1, W * Cout), lambda b: (0, 0)),
                pl.BlockSpec((1, W * Cout), lambda b: (0, 0)),
            ],
            out_specs=pl.BlockSpec((bt, H, W * Cout), lambda b: (b, 0, 0)),
            scratch_shapes=[
                # height-padded conv2 input (lane-dense, W*Cm = 128 here)
                pltpu.VMEM((bt, H + 2, W * Cm), jnp.bfloat16),
            ],
        ),
        compiler_params=pltpu.CompilerParams(
            dimension_semantics=("parallel",),
            vmem_limit_bytes=32 * 1024 * 1024,
        ),
    )(x_lane, w1b, s1f, t1f, w2b, s2f, t2f)

    out_nhwc = out_flat.reshape(B, H, W, Cout).astype(jnp.float32)
    return jnp.transpose(out_nhwc, (0, 3, 1, 2))


def ref_double_conv(x, w1, b1, s1, t1, w2, b2, s2, t2):
    """Pure-JAX (XLA, f32) reference, NCHW."""
    def cbr(h, w, b, s, t):
        y = jax.lax.conv_general_dilated(
            h, w, window_strides=(1, 1), padding=((1, 1), (1, 1)),
            dimension_numbers=('NCHW', 'OIHW', 'NCHW'))
        y = y + b[None, :, None, None]
        y = y * s[None, :, None, None] + t[None, :, None, None]
        return jnp.maximum(y, 0.0)

    return cbr(cbr(x, w1, b1, s1, t1), w2, b2, s2, t2)


if __name__ == "__main__":
    # DoubleConv(in_channels=4, out_channels=8); mid_channels defaults to out_channels.
    B, Cin, Cout, H, W = 2, 4, 8, 16, 16
    Cm = Cout
    eps = 1e-5

    key = jax.random.PRNGKey(0)
    ks = jax.random.split(key, 14)
    x = jax.random.normal(ks[0], (B, Cin, H, W), jnp.float32)

    # conv1 / bn1
    w1 = 0.2 * jax.random.normal(ks[1], (Cm, Cin, 3, 3), jnp.float32)
    b1 = 0.1 * jax.random.normal(ks[2], (Cm,), jnp.float32)
    g1 = 1.0 + 0.1 * jax.random.normal(ks[3], (Cm,), jnp.float32)
    be1 = 0.1 * jax.random.normal(ks[4], (Cm,), jnp.float32)
    m1 = 0.1 * jax.random.normal(ks[5], (Cm,), jnp.float32)
    v1 = 1.0 + 0.1 * jnp.abs(jax.random.normal(ks[6], (Cm,), jnp.float32))
    # conv2 / bn2
    w2 = 0.2 * jax.random.normal(ks[7], (Cout, Cm, 3, 3), jnp.float32)
    b2 = 0.1 * jax.random.normal(ks[8], (Cout,), jnp.float32)
    g2 = 1.0 + 0.1 * jax.random.normal(ks[9], (Cout,), jnp.float32)
    be2 = 0.1 * jax.random.normal(ks[10], (Cout,), jnp.float32)
    m2 = 0.1 * jax.random.normal(ks[11], (Cout,), jnp.float32)
    v2 = 1.0 + 0.1 * jnp.abs(jax.random.normal(ks[12], (Cout,), jnp.float32))

    # fold BatchNorm (eval mode): y = (conv + bias) * scale + shift
    s1 = g1 / jnp.sqrt(v1 + eps)
    t1 = be1 - m1 * s1
    s2 = g2 / jnp.sqrt(v2 + eps)
    t2 = be2 - m2 * s2

    out = double_conv_forward(x, w1, b1, s1, t1, w2, b2, s2, t2)
    out = jax.block_until_ready(out)

    ref = jax.block_until_ready(ref_double_conv(x, w1, b1, s1, t1, w2, b2, s2, t2))
    assert out.shape == (B, Cout, H, W), out.shape
    # kernel computes in bf16 with f32 accumulation (bf16 output store);
    # reference is pure f32.
    np.testing.assert_allclose(np.asarray(out), np.asarray(ref), rtol=1e-1, atol=1e-1)

    print("KERNEL_OK")
</pallas_src>

<mosaic_0001>
module attributes {stable_mosaic.version = 11 : i64} {
  func.func @double_conv_kernel(%arg0: i32, %arg1: memref<1x18x64xbf16, #tpu.memory_space<vmem>>, %arg2: memref<3x64x128xbf16, #tpu.memory_space<vmem>>, %arg3: memref<1x128xf32, #tpu.memory_space<vmem>>, %arg4: memref<1x128xf32, #tpu.memory_space<vmem>>, %arg5: memref<3x128x128xbf16, #tpu.memory_space<vmem>>, %arg6: memref<1x128xf32, #tpu.memory_space<vmem>>, %arg7: memref<1x128xf32, #tpu.memory_space<vmem>>, %arg8: memref<1x16x128xbf16, #tpu.memory_space<vmem>>, %arg9: memref<1x18x128xbf16, #tpu.memory_space<vmem>>) attributes {dimension_semantics = [#tpu.dimension_semantics<parallel>], iteration_bounds = array<i64: 2>, scalar_prefetch = 0 : i64, scratch_operands = 1 : i64, tpu.core_type = #tpu.core_type<tc>, window_params = [{transform_indices = @transform_0, window_bounds = array<i64: 1, 18, 64>}, {pipeline_mode = #tpu.pipeline_mode<synchronous>, transform_indices = @transform_1, window_bounds = array<i64: 3, 64, 128>}, {pipeline_mode = #tpu.pipeline_mode<synchronous>, transform_indices = @transform_2, window_bounds = array<i64: 1, 128>}, {pipeline_mode = #tpu.pipeline_mode<synchronous>, transform_indices = @transform_3, window_bounds = array<i64: 1, 128>}, {pipeline_mode = #tpu.pipeline_mode<synchronous>, transform_indices = @transform_4, window_bounds = array<i64: 3, 128, 128>}, {pipeline_mode = #tpu.pipeline_mode<synchronous>, transform_indices = @transform_5, window_bounds = array<i64: 1, 128>}, {pipeline_mode = #tpu.pipeline_mode<synchronous>, transform_indices = @transform_6, window_bounds = array<i64: 1, 128>}, {transform_indices = @transform_7, window_bounds = array<i64: 1, 16, 128>}]} {
    %cst = arith.constant 0.000000e+00 : f32
    %0 = vector.broadcast %cst : f32 to vector<16x128xf32>
    %c0 = arith.constant 0 : index
    %c0_0 = arith.constant 0 : index
    %c0_1 = arith.constant 0 : index
    %1 = vector.load %arg1[%c0, %c0_0, %c0_1] : memref<1x18x64xbf16, #tpu.memory_space<vmem>>, vector<1x16x64xbf16>
    %2 = vector.shape_cast %1 : vector<1x16x64xbf16> to vector<16x64xbf16>
    %c0_2 = arith.constant 0 : index
    %c0_3 = arith.constant 0 : index
    %c0_4 = arith.constant 0 : index
    %3 = vector.load %arg2[%c0_2, %c0_3, %c0_4] : memref<3x64x128xbf16, #tpu.memory_space<vmem>>, vector<1x64x128xbf16>
    %4 = vector.shape_cast %3 : vector<1x64x128xbf16> to vector<64x128xbf16>
    %cst_5 = arith.constant dense<0.000000e+00> : vector<16x128xf32>
    %5 = tpu.matmul %2, %4, %cst_5 {dimension_numbers = #tpu.dot_dimension_numbers<[1], [0], [0], [1], [0, 0, 1, 1], [], []>} : vector<16x64xbf16>, vector<64x128xbf16>, vector<16x128xf32> -> vector<16x128xf32>
    %6 = arith.addf %0, %5 : vector<16x128xf32>
    %c0_6 = arith.constant 0 : index
    %c1 = arith.constant 1 : index
    %c0_7 = arith.constant 0 : index
    %7 = vector.load %arg1[%c0_6, %c1, %c0_7] : memref<1x18x64xbf16, #tpu.memory_space<vmem>>, vector<1x16x64xbf16>
    %8 = vector.shape_cast %7 : vector<1x16x64xbf16> to vector<16x64xbf16>
    %c1_8 = arith.constant 1 : index
    %c0_9 = arith.constant 0 : index
    %c0_10 = arith.constant 0 : index
    %9 = vector.load %arg2[%c1_8, %c0_9, %c0_10] : memref<3x64x128xbf16, #tpu.memory_space<vmem>>, vector<1x64x128xbf16>
    %10 = vector.shape_cast %9 : vector<1x64x128xbf16> to vector<64x128xbf16>
    %cst_11 = arith.constant dense<0.000000e+00> : vector<16x128xf32>
    %11 = tpu.matmul %8, %10, %cst_11 {dimension_numbers = #tpu.dot_dimension_numbers<[1], [0], [0], [1], [0, 0, 1, 1], [], []>} : vector<16x64xbf16>, vector<64x128xbf16>, vector<16x128xf32> -> vector<16x128xf32>
    %12 = arith.addf %6, %11 : vector<16x128xf32>
    %c0_12 = arith.constant 0 : index
    %c2 = arith.constant 2 : index
    %c0_13 = arith.constant 0 : index
    %13 = vector.load %arg1[%c0_12, %c2, %c0_13] : memref<1x18x64xbf16, #tpu.memory_space<vmem>>, vector<1x16x64xbf16>
    %14 = vector.shape_cast %13 : vector<1x16x64xbf16> to vector<16x64xbf16>
    %c2_14 = arith.constant 2 : index
    %c0_15 = arith.constant 0 : index
    %c0_16 = arith.constant 0 : index
    %15 = vector.load %arg2[%c2_14, %c0_15, %c0_16] : memref<3x64x128xbf16, #tpu.memory_space<vmem>>, vector<1x64x128xbf16>
    %16 = vector.shape_cast %15 : vector<1x64x128xbf16> to vector<64x128xbf16>
    %cst_17 = arith.constant dense<0.000000e+00> : vector<16x128xf32>
    %17 = tpu.matmul %14, %16, %cst_17 {dimension_numbers = #tpu.dot_dimension_numbers<[1], [0], [0], [1], [0, 0, 1, 1], [], []>} : vector<16x64xbf16>, vector<64x128xbf16>, vector<16x128xf32> -> vector<16x128xf32>
    %18 = arith.addf %12, %17 : vector<16x128xf32>
    %c0_18 = arith.constant 0 : index
    %c0_19 = arith.constant 0 : index
    %19 = vector.load %arg3[%c0_18, %c0_19] : memref<1x128xf32, #tpu.memory_space<vmem>>, vector<1x128xf32>
    %20 = vector.broadcast %19 : vector<1x128xf32> to vector<16x128xf32>
    %21 = arith.mulf %18, %20 : vector<16x128xf32>
    %c0_20 = arith.constant 0 : index
    %c0_21 = arith.constant 0 : index
    %22 = vector.load %arg4[%c0_20, %c0_21] : memref<1x128xf32, #tpu.memory_space<vmem>>, vector<1x128xf32>
    %23 = vector.broadcast %22 : vector<1x128xf32> to vector<16x128xf32>
    %24 = arith.addf %21, %23 : vector<16x128xf32>
    %cst_22 = arith.constant 0.000000e+00 : f32
    %25 = vector.broadcast %cst_22 : f32 to vector<16x128xf32>
    %26 = arith.maximumf %24, %25 : vector<16x128xf32>
    %cst_23 = arith.constant 0.000000e+00 : bf16
    %27 = vector.broadcast %cst_23 : bf16 to vector<1x1x128xbf16>
    %c0_24 = arith.constant 0 : index
    %c0_25 = arith.constant 0 : index
    %c0_26 = arith.constant 0 : index
    %28 = vector.load %arg9[%c0_24, %c0_25, %c0_26] : memref<1x18x128xbf16, #tpu.memory_space<vmem>>, vector<1x1x128xbf16>
    tpu.vector_store %arg9[%c0_24, %c0_25, %c0_26], %27 {strides = array<i32>} : memref<1x18x128xbf16, #tpu.memory_space<vmem>>, vector<1x1x128xbf16>,
    %c0_27 = arith.constant 0 : index
    %c17 = arith.constant 17 : index
    %c0_28 = arith.constant 0 : index
    %29 = vector.load %arg9[%c0_27, %c17, %c0_28] : memref<1x18x128xbf16, #tpu.memory_space<vmem>>, vector<1x1x128xbf16>
    tpu.vector_store %arg9[%c0_27, %c17, %c0_28], %27 {strides = array<i32>} : memref<1x18x128xbf16, #tpu.memory_space<vmem>>, vector<1x1x128xbf16>,
    %30 = vector.shape_cast %26 : vector<16x128xf32> to vector<1x16x128xf32>
    %31 = arith.truncf %30 : vector<1x16x128xf32> to vector<1x16x128xbf16>
    %c0_29 = arith.constant 0 : index
    %c1_30 = arith.constant 1 : index
    %c0_31 = arith.constant 0 : index
    %32 = vector.load %arg9[%c0_29, %c1_30, %c0_31] : memref<1x18x128xbf16, #tpu.memory_space<vmem>>, vector<1x16x128xbf16>
    tpu.vector_store %arg9[%c0_29, %c1_30, %c0_31], %31 {strides = array<i32>} : memref<1x18x128xbf16, #tpu.memory_space<vmem>>, vector<1x16x128xbf16>,
    %cst_32 = arith.constant 0.000000e+00 : f32
    %33 = vector.broadcast %cst_32 : f32 to vector<16x128xf32>
    %c0_33 = arith.constant 0 : index
    %c0_34 = arith.constant 0 : index
    %c0_35 = arith.constant 0 : index
    %34 = vector.load %arg9[%c0_33, %c0_34, %c0_35] : memref<1x18x128xbf16, #tpu.memory_space<vmem>>, vector<1x16x128xbf16>
    %35 = vector.shape_cast %34 : vector<1x16x128xbf16> to vector<16x128xbf16>
    %c0_36 = arith.constant 0 : index
    %c0_37 = arith.constant 0 : index
    %c0_38 = arith.constant 0 : index
    %36 = vector.load %arg5[%c0_36, %c0_37, %c0_38] : memref<3x128x128xbf16, #tpu.memory_space<vmem>>, vector<1x128x128xbf16>
    %37 = vector.shape_cast %36 : vector<1x128x128xbf16> to vector<128x128xbf16>
    %cst_39 = arith.constant dense<0.000000e+00> : vector<16x128xf32>
    %38 = tpu.matmul %35, %37, %cst_39 {dimension_numbers = #tpu.dot_dimension_numbers<[1], [0], [0], [1], [0, 0, 1, 1], [], []>} : vector<16x128xbf16>, vector<128x128xbf16>, vector<16x128xf32> -> vector<16x128xf32>
    %39 = arith.addf %33, %38 : vector<16x128xf32>
    %c0_40 = arith.constant 0 : index
    %c1_41 = arith.constant 1 : index
    %c0_42 = arith.constant 0 : index
    %40 = vector.load %arg9[%c0_40, %c1_41, %c0_42] : memref<1x18x128xbf16, #tpu.memory_space<vmem>>, vector<1x16x128xbf16>
    %41 = vector.shape_cast %40 : vector<1x16x128xbf16> to vector<16x128xbf16>
    %c1_43 = arith.constant 1 : index
    %c0_44 = arith.constant 0 : index
    %c0_45 = arith.constant 0 : index
    %42 = vector.load %arg5[%c1_43, %c0_44, %c0_45] : memref<3x128x128xbf16, #tpu.memory_space<vmem>>, vector<1x128x128xbf16>
    %43 = vector.shape_cast %42 : vector<1x128x128xbf16> to vector<128x128xbf16>
    %cst_46 = arith.constant dense<0.000000e+00> : vector<16x128xf32>
    %44 = tpu.matmul %41, %43, %cst_46 {dimension_numbers = #tpu.dot_dimension_numbers<[1], [0], [0], [1], [0, 0, 1, 1], [], []>} : vector<16x128xbf16>, vector<128x128xbf16>, vector<16x128xf32> -> vector<16x128xf32>
    %45 = arith.addf %39, %44 : vector<16x128xf32>
    %c0_47 = arith.constant 0 : index
    %c2_48 = arith.constant 2 : index
    %c0_49 = arith.constant 0 : index
    %46 = vector.load %arg9[%c0_47, %c2_48, %c0_49] : memref<1x18x128xbf16, #tpu.memory_space<vmem>>, vector<1x16x128xbf16>
    %47 = vector.shape_cast %46 : vector<1x16x128xbf16> to vector<16x128xbf16>
    %c2_50 = arith.constant 2 : index
    %c0_51 = arith.constant 0 : index
    %c0_52 = arith.constant 0 : index
    %48 = vector.load %arg5[%c2_50, %c0_51, %c0_52] : memref<3x128x128xbf16, #tpu.memory_space<vmem>>, vector<1x128x128xbf16>
    %49 = vector.shape_cast %48 : vector<1x128x128xbf16> to vector<128x128xbf16>
    %cst_53 = arith.constant dense<0.000000e+00> : vector<16x128xf32>
    %50 = tpu.matmul %47, %49, %cst_53 {dimension_numbers = #tpu.dot_dimension_numbers<[1], [0], [0], [1], [0, 0, 1, 1], [], []>} : vector<16x128xbf16>, vector<128x128xbf16>, vector<16x128xf32> -> vector<16x128xf32>
    %51 = arith.addf %45, %50 : vector<16x128xf32>
    %c0_54 = arith.constant 0 : index
    %c0_55 = arith.constant 0 : index
    %52 = vector.load %arg6[%c0_54, %c0_55] : memref<1x128xf32, #tpu.memory_space<vmem>>, vector<1x128xf32>
    %53 = vector.broadcast %52 : vector<1x128xf32> to vector<16x128xf32>
    %54 = arith.mulf %51, %53 : vector<16x128xf32>
    %c0_56 = arith.constant 0 : index
    %c0_57 = arith.constant 0 : index
    %55 = vector.load %arg7[%c0_56, %c0_57] : memref<1x128xf32, #tpu.memory_space<vmem>>, vector<1x128xf32>
    %56 = vector.broadcast %55 : vector<1x128xf32> to vector<16x128xf32>
    %57 = arith.addf %54, %56 : vector<16x128xf32>
    %cst_58 = arith.constant 0.000000e+00 : f32
    %58 = vector.broadcast %cst_58 : f32 to vector<16x128xf32>
    %59 = arith.maximumf %57, %58 : vector<16x128xf32>
    %60 = vector.shape_cast %59 : vector<16x128xf32> to vector<1x16x128xf32>
    %61 = arith.truncf %60 : vector<1x16x128xf32> to vector<1x16x128xbf16>
    %c0_59 = arith.constant 0 : index
    %c0_60 = arith.constant 0 : index
    %c0_61 = arith.constant 0 : index
    %62 = vector.load %arg8[%c0_59, %c0_60, %c0_61] : memref<1x16x128xbf16, #tpu.memory_space<vmem>>, vector<1x16x128xbf16>
    tpu.vector_store %arg8[%c0_59, %c0_60, %c0_61], %61 {strides = array<i32>} : memref<1x16x128xbf16, #tpu.memory_space<vmem>>, vector<1x16x128xbf16>,
    return
  }
  func.func @transform_0(%arg0: i32) -> (i32, i32, i32) {
    %c0_i32 = arith.constant 0 : i32
    %c0_i32_0 = arith.constant 0 : i32
    %c0_i32_1 = arith.constant 0 : i32
    return %arg0, %c0_i32, %c0_i32_0 : i32, i32, i32
  }
  func.func @transform_1(%arg0: i32) -> (i32, i32, i32) {
    %c0_i32 = arith.constant 0 : i32
    %c0_i32_0 = arith.constant 0 : i32
    %c0_i32_1 = arith.constant 0 : i32
    %c0_i32_2 = arith.constant 0 : i32
    return %c0_i32, %c0_i32_0, %c0_i32_1 : i32, i32, i32
  }
  func.func @transform_2(%arg0: i32) -> (i32, i32) {
    %c0_i32 = arith.constant 0 : i32
    %c0_i32_0 = arith.constant 0 : i32
    %c0_i32_1 = arith.constant 0 : i32
    return %c0_i32, %c0_i32_0 : i32, i32
  }
  func.func @transform_3(%arg0: i32) -> (i32, i32) {
    %c0_i32 = arith.constant 0 : i32
    %c0_i32_0 = arith.constant 0 : i32
    %c0_i32_1 = arith.constant 0 : i32
    return %c0_i32, %c0_i32_0 : i32, i32
  }
  func.func @transform_4(%arg0: i32) -> (i32, i32, i32) {
    %c0_i32 = arith.constant 0 : i32
    %c0_i32_0 = arith.constant 0 : i32
    %c0_i32_1 = arith.constant 0 : i32
    %c0_i32_2 = arith.constant 0 : i32
    return %c0_i32, %c0_i32_0, %c0_i32_1 : i32, i32, i32
  }
  func.func @transform_5(%arg0: i32) -> (i32, i32) {
    %c0_i32 = arith.constant 0 : i32
    %c0_i32_0 = arith.constant 0 : i32
    %c0_i32_1 = arith.constant 0 : i32
    return %c0_i32, %c0_i32_0 : i32, i32
  }
  func.func @transform_6(%arg0: i32) -> (i32, i32) {
    %c0_i32 = arith.constant 0 : i32
    %c0_i32_0 = arith.constant 0 : i32
    %c0_i32_1 = arith.constant 0 : i32
    return %c0_i32, %c0_i32_0 : i32, i32
  }
  func.func @transform_7(%arg0: i32) -> (i32, i32, i32) {
    %c0_i32 = arith.constant 0 : i32
    %c0_i32_0 = arith.constant 0 : i32
    %c0_i32_1 = arith.constant 0 : i32
    return %arg0, %c0_i32, %c0_i32_0 : i32, i32, i32
  }
}

</mosaic_0001>

<bundles_post_ra>
// kernel: tpu_custom_call.1
= control target key start
LH: loop header
LB: loop body
LE: loop exit
PB: predicated region body
PF: predicated region fallthrough
CT: control target
= control target key end

     0   :  { %12 = vsyncpa [#allocation4], 0  ;;  %s1554_s0 = inlined_call_operand.vmem [shape: bf16[2,18,64], index: 0, kind: input, shape index: {}]   ;;  %s1555_s1 = inlined_call_operand.hbm [shape: bf16[3,64,128], index: 1, kind: input, shape index: {}]   ;;  %s1556_s2 = inlined_call_operand.vmem [shape: f32[1,128], index: 2, kind: input, shape index: {}]   ;;  %s1557_s3 = inlined_call_operand.vmem [shape: f32[1,128], index: 3, kind: input, shape index: {}]   ;;  %s1558_s4 = inlined_call_operand.hbm [shape: bf16[3,128,128], index: 4, kind: input, shape index: {}]   ;;  %s1559_s5 = inlined_call_operand.vmem [shape: f32[1,128], index: 5, kind: input, shape index: {}]   ;;  %s1560_s6 = inlined_call_operand.vmem [shape: f32[1,128], index: 6, kind: input, shape index: {}]   ;;  %s1561_s7 = inlined_call_operand.hbm [shape: bf16[2,16,128], index: 7, kind: output, shape index: {}]  }
   0x1   :  { %13 = vsyncpa [#allocation7], 0 }
   0x2   :  { %14 = vsyncpa [#allocation5], 0 }
   0x3   :  { %16 = vsyncpa [#allocation5 + $0x1], 0  ;;  %s1407_s24 = smov 0   ;;  %s1409_s25 = smov 0  }
   0x4   :  { %s1411_s26 = smov 0   ;;  %s1413_s27 = smov 0  }
   0x5 LB: > { %s1428_s28 = sadd.s32 4294967295, %s1359_s27   ;;  %s942_s29 = sadd.s32 4294967294, %s1359_s27   ;;  %s1359_s27 = sphi %s1413_s27, %s1570_s27   ;;  %s1355_s26 = sphi %s1411_s26, %s1569_s26   ;;  %s1351_s25 = sphi %s1409_s25, %s1568_s25   ;;  %s1347_s24 = sphi %s1407_s24, %s1567_s24  }
   0x6   : > { %s1432_s30 = sadd.s32 1, %s1359_s27   ;;  %s181_s8 = sadd.s32 1, %s1355_s26 }
   0x7   : > { %s178_s9 = ssub.s32 %s1359_s27, %s1432_s30  ;;  %p191_p0 = scmp.ne.s32.totalorder %s1355_s26, %s1351_s25 }
   0x8   : > { %p179_p1 = scmp.eq.s32.totalorder %s178_s9, 0  ;;  %p192_p2 = scmp.eq.s32.totalorder %s1428_s28, 1 }
   0x9   : > { %p197_p3 = scmp.ne.s32.totalorder %s1351_s25, %s1347_s24  ;;  %p198_p4 = scmp.eq.s32.totalorder %s942_s29, 1 }
   0xa   : > { %s1443_s10 = scalar_select %p179_p1, %s1355_s26, %s181_s8  }
   0xb   : > { %p1445_p5 = por %p192_p2, %p191_p0  ;;  %p1449_p6 = por %p198_p4, %p197_p3 }
   0xc   : > { %p943_p7 = scmp.ge.s32.totalorder %s1359_s27, 1  ;;  %p205_p8 = scmp.lt.s32.totalorder %s1359_s27, 3 }
   0xd   : > { %p1182_p9 = scmp.eq.s32.totalorder %s1428_s28, 0  ;;  %s216_s16 = sshll.u32 %s1555_s1, 4  ;;  %s217_s16 = int_to_ptr.hbm [resolvable:$true] %s216_s16 }
   0xe   : > { %p1456_p10 = pnand %p943_p7, %p205_p8  ;;  %s1361_s17 = smov [#allocation3]  }
   0xf   : > { %s218_s18 = sshll.u32 %s1361_s17, 4  ;;  %s236_s21 = sshll.u32 %s1558_s4, 4  ;;  %s219_s18 = int_to_ptr.vmem [resolvable:$true] %s218_s18  ;;  %s237_s21 = int_to_ptr.hbm [resolvable:$true] %s236_s21 }
  0x10   : > { %p1171_p11 = pneg %p1456_p10  ;;  %s1362_s22 = smov 64  }
  0x11   : > { %s1363_s23 = smov 4   ;;  %s1364_s29 = smov [#allocation6]  }
  0x12   : > { %p1172_p12 = pnand %p1182_p9, %p1171_p11  ;;  %s238_s8 = sshll.u32 %s1364_s29, 4  ;;  %s239_s8 = int_to_ptr.vmem [resolvable:$true] %s238_s8 }
  0x13   : > { %268 = sbr.rel (%p1456_p10) target bundleno = 392 (0x188), region = 48 }
  0x14   : > { %1174 = dma.hbm_to_vmem [thread:$0]  (!%p1172_p12), %s217_s16, 1536, %s219_s18, [#allocation4], %s1362_s22, %s1362_s22, %s1363_s23  }
  0x15   : > { %1177 = dma.hbm_to_vmem [thread:$0]  (!%p1172_p12), %s237_s21, 3072, %s239_s8, [#allocation7], %s1362_s22, %s1362_s22, %s1363_s23  }
  0x18   : > { %1334 = dma.done.wait (%p1182_p9), [#allocation4], 1536  }
  0x19   : > { %1336 = vsyncadd (%p1182_p9), [#allocation4], 4294965760 }
  0x1a   : > { %1338 = dma.done.wait (%p1182_p9), [#allocation7], 3072  }
  0x1b   : > { %1340 = vsyncadd (%p1182_p9), [#allocation7], 4294964224  ;;  %p306_p13 = scmp.lt.s32.totalorder %s1428_s28, 1  ;;  %v1111_v0 = vld [vmem:[#allocation3 + $0x38] sm:$0xff]  ;;  %v1110_v2 = vld [vmem:[#allocation3 + $0x30] sm:$0xff]  ;;  %vm377_vm1 = vcmask 523264  }
  0x1c   : > { %v1107_v1 = vld [vmem:[#allocation3 + $0x18] sm:$0xff]  ;;  %385 = vmatpush.bf16.msra.mxu2 %v1111_v0  ;;  %v1106_v3 = vld [vmem:[#allocation3 + $0x10] sm:$0xff]  ;;  %v1109_v8 = vld [vmem:[#allocation3 + $0x28] sm:$0xff]  ;;  %vm340_vm0 = vsmask.f32 7424  ;;  %vm448_vm2 = vcmask 1046528  }
  0x1d   : > { %s307_s9 = scalar_select %p306_p13, %s1428_s28, 1  ;;  %425 = vmatpush.bf16.msra.mxu1 %v1107_v1  ;;  %v1105_v9 = vld [vmem:[#allocation3 + $0x8] sm:$0xff]  ;;  %v1108_v14 = vld [vmem:[#allocation3 + $0x20] sm:$0xff]  ;;  %v1115_v18 = vld [vmem:[#allocation3 + $0x58] sm:$0xff]  ;;  %vm509_vm3 = vcmask 1040384   ;;  %vm544_vm8 = vcmask 1043456  }
  0x1e   : > { %v1104_v17 = vld [vmem:[#allocation3] sm:$0xff]  ;;  %v1114_v20 = vld [vmem:[#allocation3 + $0x50] sm:$0xff]  ;;  %v1113_v21 = vld [vmem:[#allocation3 + $0x48] sm:$0xff]  ;;  %vm510_vm4 = vsmask.f32 256  ;;  %s303_s23 = sand.u32 1, %s1351_s25  }
  0x1f   : > { %s1160_s14 = smul.u32 12, %s307_s9  ;;  %v1112_v25 = vld [vmem:[#allocation3 + $0x40] sm:$0xff]  ;;  %v1123_v29 = vld [vmem:[#allocation6 + $0x38] sm:$0xff]  ;;  %v1122_v30 = vld [vmem:[#allocation6 + $0x30] sm:$0xff]  ;;  %vm515_vm6 = vsmask.f32 7938 }
  0x20   : > { %386 = vmatpush.bf16.msra.mxu2 %v1110_v2  ;;  %721 = vmatpush.bf16.msra.mxu0 %v1123_v29  ;;  %vm1497_vm5 = vmand %vm509_vm3, %vm510_vm4  ;;  %v512_v32 = vld [vmem:[#allocation2] sm:$0x1]  ;;  %v517_v33 = vld [vmem:[#allocation2 + $0x8] sm:$0x1]  ;;  %vm522_vm10 = vsmask.f32 4368 }
  0x21   : > { %s1485_s16 = scalar_lea.vmem %s1554_s0, %s1160_s14  ;;  %426 = vmatpush.bf16.msra.mxu1 %v1106_v3  ;;  %v513_v34 = vsel %vm1497_vm5, 0, %v512_v32  ;;  %vm516_vm7 = vmand %vm509_vm3, %vm515_vm6  ;;  %v1139_v36 = vld [vmem:[#allocation6 + $0xb8] sm:$0xff]  ;;  %v1121_v37 = vld [vmem:[#allocation6 + $0x28] sm:$0xff]  ;;  %s950_s9 = sshll.u32 %s303_s23, 3 }
  0x22   : > { %v1142_v4 = vld [vmem:[%s1485_s16] sm:$0xff]   ;;  %v322_v5 = vld [vmem:[%s1485_s16 + $0x8] sm:$0x1]  ;;  %514 = vst [vmem:[#allocation2] sm:$0x1] %v513_v34  ;;  %v518_v35 = vsel %vm516_vm7, 0, %v517_v33  ;;  %vm545_vm9 = vmand %vm544_vm8, %vm515_vm6 }
  0x23   : > { %v337_v6 = vunpack.c.l.b16 %v322_v5  ;;  %v344_v7 = vshll.u32 %v1142_v4, 16  ;;  %v342_v11 = vshrl.u32 %v1142_v4, 16  ;;  %v1154_v22 = vld [vmem:[%s1485_s16] sm:$0xf0]  ;;  %v1155_v23 = vld [vmem:[%s1485_s16] sm:$0xe]  ;;  %vm523_vm11 = vmor %vm510_vm4, %vm522_vm10 }
  0x24   : > { %387 = vmatpush.bf16.msra.mxu2 %v1109_v8  ;;  %v1156_v24 = vor.u32 %v1155_v23, %v1154_v22  ;;  %722 = vmatpush.bf16.msra.mxu0 %v1122_v30  ;;  %519 = vst [vmem:[#allocation2 + $0x8] sm:$0x1] %v518_v35  ;;  %v1131_v38 = vld [vmem:[#allocation6 + $0x78] sm:$0xff]  ;;  %v1138_v39 = vld [vmem:[#allocation6 + $0xb0] sm:$0xff]  ;;  %v1120_v40 = vld [vmem:[#allocation6 + $0x20] sm:$0xff]  ;;  %s1140_s14 = sshll.u32 %s1428_s28, 3 }
  0x25   : > { %v339_v10 = vpack.c.b16 %v337_v6, %v337_v6  ;;  %v346_v12 = vrot.slane %v344_v7, 1  ;;  %427 = vmatpush.bf16.msra.mxu1 %v1105_v9  ;;  %658 = vmatpush.bf16.msra.mxu3 %v1131_v38  ;;  %v1130_v41 = vld [vmem:[#allocation6 + $0x70] sm:$0xff]  ;;  %v1137_v43 = vld [vmem:[#allocation6 + $0xa8] sm:$0xff]  ;;  %v1119_v44 = vld [vmem:[#allocation6 + $0x18] sm:$0xff]  ;;  %s854_s16 = scalar_lea.hbm %s1561_s7, %s1140_s14  ;;  %s305_s17 = scalar_lea.vmem [#allocation8], %s950_s9 }
  0x26   : > { %v449_v26 = vrot.slane %v1156_v24, 1  ;;  %v1129_v45 = vld [vmem:[#allocation6 + $0x68] sm:$0xff]  ;;  %v1136_v46 = vld [vmem:[#allocation6 + $0xa0] sm:$0xff]  ;;  %v1118_v47 = vld [vmem:[#allocation6 + $0x10] sm:$0xff]  ;;  %s855_s18 = sshll.u32 %s305_s17, 4  ;;  %s857_s19 = sshll.u32 %s854_s16, 4  ;;  %s856_s18 = int_to_ptr.vmem [resolvable:$true] %s855_s18  ;;  %s858_s19 = int_to_ptr.hbm [resolvable:$true] %s857_s19 }
  0x27   : > { %v349_v13 = vshll.u32 %v339_v10, 16  ;;  %v347_v15 = vor.u32 %v346_v12, %v342_v11  ;;  %v450_v27 = vrot.slane %v339_v10, 1  ;;  %v1128_v48 = vld [vmem:[#allocation6 + $0x60] sm:$0xff]  ;;  %v1135_v50 = vld [vmem:[#allocation6 + $0x98] sm:$0xff]  ;;  %v1117_v52 = vld [vmem:[#allocation6 + $0x8] sm:$0xff]  ;;  %s843_s28 = scalar_lea.sflag [#allocation5], %s303_s23 }
  0x28   : > { %388 = vmatpush.bf16.msra.mxu2 %v1108_v14  ;;  %723 = vmatpush.bf16.msra.mxu0 %v1121_v37  ;;  %v1127_v53 = vld [vmem:[#allocation6 + $0x58] sm:$0xff]  ;;  %v1134_v54 = vld [vmem:[#allocation6 + $0x90] sm:$0xff]  ;;  %v1116_v55 = vld [vmem:[#allocation6] sm:$0xff]  ;;  %s1303_s20 = sshra.s32 %s858_s19, 4  ;;  %s1309_s8 = scalar_lea.hbm %s1561_s7, 16  ;;  %s1304_s20 = int_to_ptr.hbm [resolvable:$true] %s1303_s20 }
  0x29   : > { %v351_v16 = vrot.slane %v349_v13, 1  ;;  %428 = vmatpush.bf16.msra.mxu1 %v1104_v17  ;;  %v451_v28 = vsel %vm448_vm2, %v449_v26, %v450_v27  ;;  %659 = vmatpush.bf16.msra.mxu3 %v1130_v41  ;;  %v1126_v56 = vld [vmem:[#allocation6 + $0x50] sm:$0xff]  ;;  %v1133_v62 = vld [vmem:[#allocation6 + $0x88] sm:$0xff]  ;;  %v1132_v2 = vld [vmem:[#allocation6 + $0x80] sm:$0xff]  ;;  %s1305_s21 = scalar_lea.hbm %s1304_s20, 8  ;;  %p1310_p3 = scmp.lt.s32.totalorder %s1304_s20, %s1561_s7 }
  0x2a   : > { %v1225_v58 = vld [vmem:[%s1556_s2] ss:$0 sm:$0xff]  ;;  %v1125_v0 = vld [vmem:[#allocation6 + $0x48] sm:$0xff]  ;;  %p1306_p0 = scmp.ne.s32.totalorder %s1304_s20, %s1305_s21  ;;  %p1311_p4 = scmp.lt.s32.totalorder %s1309_s8, %s1305_s21 }
  0x2b   : > { %v352_v19 = vsel %vm340_vm0, %v347_v15, %v351_v16  ;;  %v1226_v61 = vld [vmem:[%s1557_s3] ss:$0 sm:$0xff]  ;;  %v550_v23 = vld [vmem:[#allocation2 + $0x8] sm:$0x1] }
  0x2c   : > { %483 = vmatpush.bf16.msrb.mxu2 %v1115_v18  ;;  %985 = vmatmul.msk.bf16.vlgmr.msra.gmra.mxu1 %vm377_vm1, %v1142_v4  ;;  %v1124_v4 = vld [vmem:[#allocation6 + $0x40] sm:$0xff]  ;;  %v546_v15 = vld [vmem:[#allocation2] sm:$0xf]  ;;  %p1307_p1 = pnand %p1306_p0, %p1445_p5  ;;  %p1312_p7 = por %p1311_p4, %p1310_p3 }
  0x2d   : > { %968 = vmatmul.msk.bf16.vlgmr.msra.gmra.mxu2 %vm377_vm1, %v352_v19  ;;  %808 = vmatpush.bf16.msrb.mxu1 %v1139_v36 }
  0x2e   : > { %724 = vmatpush.bf16.msra.mxu0 %v1120_v40  ;;  %660 = vmatpush.bf16.msra.mxu3 %v1129_v45  ;;  %p1308_p2 = pneg %p1307_p1 }
  0x30   : > { %484 = vmatpush.bf16.msrb.mxu2 %v1114_v20  ;;  %p1313_p8 = pnand %p1312_p7, %p1308_p2 }
  0x31   : > { %809 = vmatpush.bf16.msrb.mxu1 %v1138_v39 }
  0x32   : > { %725 = vmatpush.bf16.msra.mxu0 %v1119_v44  ;;  %661 = vmatpush.bf16.msra.mxu3 %v1128_v48 }
  0x34   : > { %485 = vmatpush.bf16.msrb.mxu2 %v1113_v21 }
  0x35   : > { %810 = vmatpush.bf16.msrb.mxu1 %v1137_v43 }
  0x36   : > { %726 = vmatpush.bf16.msra.mxu0 %v1118_v47  ;;  %662 = vmatpush.bf16.msra.mxu3 %v1127_v53 }
  0x38   : > { %486 = vmatpush.bf16.msrb.mxu2 %v1112_v25 }
  0x39   : > { %811 = vmatpush.bf16.msrb.mxu1 %v1136_v46 }
  0x3a   : > { %727 = vmatpush.bf16.msra.mxu0 %v1117_v52  ;;  %663 = vmatpush.bf16.msra.mxu3 %v1126_v56 }
  0x3d   : > { %1002 = vmatmul.msk.bf16.vlgmr.msrb.gmra.mxu2 %vm377_vm1, %v451_v28  ;;  %812 = vmatpush.bf16.msrb.mxu1 %v1135_v50 }
  0x3e   : > { %728 = vmatpush.bf16.msra.mxu0 %v1116_v55  ;;  %664 = vmatpush.bf16.msra.mxu3 %v1125_v0  ;;  %v1228_v55 = vld [vmem:[%s1560_s6] ss:$0 sm:$0xff] }
  0x41   : > { %813 = vmatpush.bf16.msrb.mxu1 %v1134_v54 }
  0x42   : > { %665 = vmatpush.bf16.msra.mxu3 %v1124_v4 }
  0x45   : > { %814 = vmatpush.bf16.msrb.mxu1 %v1133_v62 }
  0x49   : > { %815 = vmatpush.bf16.msrb.mxu1 %v1132_v2 }
  0xa9   : > { %v430_v51 = vpop.f32.mrf.mxu1 }
  0xb0   : > { %v390_v42 = vpop.f32.mrf.mxu2 }
  0xb1   : > { %v431_v57 = vadd.f32 %v430_v51, %v390_v42  ;;  %v432_v1 = vpop.f32.mrf.mxu1  ;;  %v1227_v51 = vld [vmem:[%s1559_s5] ss:$0 sm:$0xff] }
  0xb8   : > { %v392_v49 = vpop.f32.mrf.mxu2 }
  0xb9   : > { %v433_v5 = vadd.f32 %v432_v1, %v392_v49 }
  0xc0   : > { %v488_v59 = vpop.f32.mrf.mxu2 }
  0xc1   : > { %v493_v60 = vadd.f32 %v488_v59, %v431_v57 }
  0xc3   : > { %v499_v63 = vmul.f32 %v1225_v58, %v493_v60 }
  0xc5   : > { %v505_v3 = vadd.f32 %v1226_v61, %v499_v63 }
  0xc7   : > { %v507_v6 = vmax.f32 %v505_v3, 0.0 }
  0xc8   : > { %v490_v7 = vpop.f32.mrf.mxu2 }
  0xc9   : > { %v520_v8 = vpack.c.bf16 %v507_v6, %v507_v6  ;;  %v494_v9 = vadd.f32 %v490_v7, %v433_v5 }
  0xcb   : > { %v525_v10 = vshrl.u32 %v520_v8, 16  ;;  %v500_v11 = vmul.f32 %v1225_v58, %v494_v9  ;;  %v528_v13 = vshll.u32 %v520_v8, 16 }
  0xcd   : > { %v527_v12 = vrot.slane %v525_v10, 7  ;;  %v506_v14 = vadd.f32 %v1226_v61, %v500_v11 }
  0xcf   : > { %v530_v16 = vor.u32 %v528_v13, %v527_v12  ;;  %v508_v17 = vmax.f32 %v506_v14, 0.0  ;;  %v531_v24 = vrot.slane %v527_v12, 4 }
  0xd1   : > { %v547_v18 = vsel %vm545_vm9, %v530_v16, %v546_v15  ;;  %v521_v19 = vpack.c.bf16 %v508_v17, %v508_v17 }
  0xd2   : > { %548 = vst [vmem:[#allocation2] sm:$0xf] %v547_v18 }
  0xd3   : > { %v533_v20 = vshrl.u32 %v521_v19, 16  ;;  %v536_v22 = vshll.u32 %v521_v19, 16 }
  0xd5   : > { %v535_v21 = vrot.slane %v533_v20, 7 }
  0xd7   : > { %v538_v25 = vor.u32 %v536_v22, %v535_v21  ;;  %v540_v26 = vrot.slane %v535_v21, 4 }
  0xd9   : > { %v539_v27 = vsel %vm523_vm11, %v531_v24, %v538_v25  ;;  %v551_v28 = vsel %vm1497_vm5, %v540_v26, %v550_v23  ;;  %v1158_v34 = vld [vmem:[#allocation2] sm:$0xe] }
  0xda   : > { %549 = vst [vmem:[#allocation2 + $0x4] sm:$0xf] %v539_v27 }
  0xdb   : > { %552 = vst [vmem:[#allocation2 + $0x8] sm:$0x1] %v551_v28 }
  0xe1   : > { %v1146_v29 = vld [vmem:[#allocation2] sm:$0xff]  }
  0xe2   : > { %v1157_v30 = vld [vmem:[#allocation2] sm:$0xf0]  ;;  %v600_v32 = vshll.u32 %v1146_v29, 16  ;;  %729 = vmatmul.bf16.vlgmr.msra.gmra.mxu0 %v1146_v29  ;;  %v571_v33 = vld [vmem:[#allocation2 + $0x8] sm:$0x1]  ;;  %v598_v39 = vshrl.u32 %v1146_v29, 16 }
  0xe3   : > { %v594_v35 = vunpack.c.l.b16 %v571_v33  ;;  %v1159_v36 = vor.u32 %v1158_v34, %v1157_v30 }
  0xe4   : > { %v602_v37 = vrot.slane %v600_v32, 1 }
  0xe5   : > { %v596_v38 = vpack.c.b16 %v594_v35, %v594_v35  ;;  %v756_v40 = vrot.slane %v1159_v36, 1 }
  0xe6   : > { %v603_v43 = vor.u32 %v602_v37, %v598_v39 }
  0xe7   : > { %v757_v41 = vrot.slane %v596_v38, 1  ;;  %v605_v42 = vshll.u32 %v596_v38, 16 }
  0xe9   : > { %v758_v31 = vsel %vm448_vm2, %v756_v40, %v757_v41  ;;  %v607_v44 = vrot.slane %v605_v42, 1 }
  0xea   : > { %816 = vmatmul.bf16.vlgmr.msrb.gmra.mxu1 %v758_v31 }
  0xeb   : > { %v608_v45 = vsel %vm340_vm0, %v603_v43, %v607_v44 }
  0xec   : > { %666 = vmatmul.bf16.vlgmr.msra.gmra.mxu3 %v608_v45 }
 0x15f   : > { %v730_v46 = vpop.f32.mrf.mxu0 }
 0x167   : > { %v817_v47 = vpop.f32.mrf.mxu1  ;;  %v732_v52 = vpop.f32.mrf.mxu0 }
 0x16f   : > { %v667_v48 = vpop.f32.mrf.mxu3  ;;  %v819_v57 = vpop.f32.mrf.mxu1 }
 0x170   : > { %v731_v49 = vadd.f32 %v730_v46, %v667_v48 }
 0x172   : > { %v822_v50 = vadd.f32 %v817_v47, %v731_v49 }
 0x174   : > { %v828_v54 = vmul.f32 %v1227_v51, %v822_v50 }
 0x176   : > { %v834_v59 = vadd.f32 %v1228_v55, %v828_v54 }
 0x177   : > { %v669_v53 = vpop.f32.mrf.mxu3 }
 0x178   : > { %v733_v56 = vadd.f32 %v732_v52, %v669_v53  ;;  %v836_v62 = vmax.f32 %v834_v59, 0.0 }
 0x17a   : > { %v823_v58 = vadd.f32 %v819_v57, %v733_v56 }
 0x17c   : > { %v829_v60 = vmul.f32 %v1227_v51, %v823_v58 }
 0x17e   : > { %v835_v61 = vadd.f32 %v1228_v55, %v829_v60 }
 0x180   : > { %v837_v63 = vmax.f32 %v835_v61, 0.0 }
 0x182   : > { %v1152_v0 = vpack.c.bf16 %v837_v63, %v836_v62 }
 0x184   : > { %1153 = vst [vmem:[%s305_s17] sm:$0xff] %v1152_v0  }
 0x185   : > { %1316 = shalt.err (!%p1313_p8)
}
 0x186   : > { %s1365_s23 = smov 64   ;;  %s1366_s15 = smov 4  }
 0x187   : > { %1169 = dma.vmem_to_hbm [thread:$0]  (%p1445_p5), %s856_s18, 128, %s858_s19, %s843_s28, %s1365_s23, %s1365_s23, %s1366_s15  }
 0x188 PF: > { %p1186_p9 = scmp.ge.s32.totalorder %s1359_s27, 2  ;;  %s872_s13 = sand.u32 1, %s1347_s24  }
 0x189   : > { %s873_s16 = scalar_lea.sflag [#allocation5], %s872_s13 }
 0x18a   : > { %p1179_p10 = pnand %p1186_p9, %p1449_p6 }
 0x18c   : > { %p1180_p11 = pneg %p1179_p10 }
 0x18e   : > { %1342 = dma.done.wait (%p1180_p11), %s873_s16, 128  }
 0x18f   : > { %1344 = vsyncadd (%p1180_p11), %s873_s16, 4294967168  ;;  %p19_p12 = scmp.ge.s32.totalorder %s1432_s30, 4   ;;  %s1567_s24 = smov %s1351_s25 }
 0x190   : > { %s1568_s25 = smov %s1355_s26  ;;  %s1569_s26 = smov %s1443_s10 }
 0x191   : > { %s1570_s27 = smov %s1432_s30  ;;  %21 = sbr.rel (!%p19_p12) target bundleno = 5 (0x5), region = 96 }
 0x196   :  { %879 = vsyncpa [#allocation4], 1 }
 0x197   :  { %881 = vsyncpa [#allocation4 + $0x1], 1 }
 0x198   :  { %882 = vsyncpa [#allocation7], 1 }
 0x199   :  { %883 = vsyncpa [#allocation5], 1 }
 0x19a   :  { %885 = vsyncpa [#allocation5 + $0x1], 1 }

</bundles_post_ra>
